<compile_context>
chip_gen: v5e
topology: v5e:2x2
jax: 0.10.0
libtpu: 0.0.40
codegen_flags: <defaults>
</compile_context>

<pallas_src>
import functools

import jax
import jax.numpy as jnp
from jax.experimental import pallas as pl
from jax.experimental.pallas import tpu as pltpu


def _round_up(a, m):
    return ((a + m - 1) // m) * m


def _masked_abs_sum_kernel(last_tile_ref, valid_ref, x_ref, y_ref, out_ref):
    """Grid (B, 2, NT_half).  out_ref: (8, lanes) f32 partial sums per (b, half).

    valid_ref[b]     = number of valid (non-pad) elements in batch b's
                       flattened (rows, lanes) view (the valid region is a
                       prefix of that view).
    last_tile_ref[b] = index of the last tile holding any valid element; used
                       only by the input index_maps to skip padded-tile DMAs.
    """
    del last_tile_ref  # consumed by the index_maps
    b = pl.program_id(0)
    h = pl.program_id(1)
    t = pl.program_id(2)
    n_half = pl.num_programs(2)
    gt = h * n_half + t                       # global tile index for this batch
    R, L = x_ref.shape

    @pl.when(t == 0)
    def _():
        out_ref[...] = jnp.zeros_like(out_ref)

    valid = valid_ref[b]
    tile_lo = gt * (R * L)
    tile_hi = tile_lo + R * L

    # Interior (fully valid) tiles: no iota / compare / select at all.
    @pl.when(tile_hi <= valid)
    def _():
        diff = jnp.abs(x_ref[...] - y_ref[...])          # input dtype (bf16 ok)
        out_ref[...] += diff.reshape(R // 8, 8, L).astype(jnp.float32).sum(axis=0)

    # Boundary tile (at most one per (b, half)): prefix mask via flat iota.
    @pl.when(jnp.logical_and(tile_lo < valid, valid < tile_hi))
    def _():
        row = jax.lax.broadcasted_iota(jnp.int32, (R, L), 0)
        lane = jax.lax.broadcasted_iota(jnp.int32, (R, L), 1)
        flat = tile_lo + row * L + lane
        diff = jnp.abs(x_ref[...] - y_ref[...])
        # Keep a *select* (never multiply-by-mask): trailing partial blocks can
        # contain unspecified data past the array end; a select never lets it
        # propagate even if it is NaN/Inf.
        masked = jnp.where(flat < valid, diff, jnp.zeros_like(diff))
        out_ref[...] += masked.reshape(R // 8, 8, L).astype(jnp.float32).sum(axis=0)

    # Fully padded tiles (tile_lo >= valid): no compute; the clamped index_map
    # already prevented a fresh DMA for them.


def _masked_l1_partials(last_tile, valid_elems, x3, y3, rows_tile, n_half):
    B, _, lanes = x3.shape

    def in_map(b, h, t, last_tile_ref, valid_ref):
        gt = h * n_half + t
        # Clamp to the last tile that holds any valid data: an unchanged block
        # index means Pallas skips the (pure-padding) DMA entirely.
        return (b, jnp.minimum(gt, last_tile_ref[b]), 0)

    grid_spec = pltpu.PrefetchScalarGridSpec(
        num_scalar_prefetch=2,                # last_tile, valid_elems -> SMEM
        grid=(B, 2, n_half),
        in_specs=[
            pl.BlockSpec((pl.Squeezed(), rows_tile, lanes), in_map),
            pl.BlockSpec((pl.Squeezed(), rows_tile, lanes), in_map),
        ],
        out_specs=pl.BlockSpec((pl.Squeezed(), pl.Squeezed(), 8, lanes),
                               lambda b, h, t, lt, v: (b, h, 0, 0)),
    )

    # Advisory cost for XLA scheduling of this bandwidth-bound custom call.
    useful_elems = B * min(x3.shape[1], y3.shape[1]) * lanes
    itemsize = jnp.dtype(x3.dtype).itemsize
    cost = pl.CostEstimate(flops=3 * useful_elems,
                           transcendentals=0,
                           bytes_accessed=2 * useful_elems * itemsize)

    return pl.pallas_call(
        _masked_abs_sum_kernel,
        out_shape=jax.ShapeDtypeStruct((B, 2, 8, lanes), jnp.float32),
        grid_spec=grid_spec,
        compiler_params=pltpu.CompilerParams(
            dimension_semantics=("parallel", "parallel", "arbitrary"),
            vmem_limit_bytes=32 * 1024 * 1024),
        cost_estimate=cost,
    )(last_tile, valid_elems, x3, y3)


@functools.partial(jax.jit, static_argnames=("rows_per_tile",))
def masked_l1_loss(x, y, x_lens, y_lens, *, rows_per_tile=4096):
    """JAX/Pallas port of Loss.forward(x, y, x_lens, y_lens, device)."""
    B, Tx, D = x.shape
    _, Ty, _ = y.shape
    T = min(Tx, Ty)                            # logical truncation length
    assert T * D < 2**31, "per-batch element count must fit in int32"
    lens = y_lens if Tx > Ty else x_lens       # mask comes from the shorter side
    lens = jnp.clip(lens.astype(jnp.int32), 0, T)
    valid_elems = lens * D                     # masked elements per batch row

    if (Tx * D) % 128 == 0 and (Ty * D) % 128 == 0:
        # Lane-dense path: free row-major reshape, 128 lanes fully used.
        lanes = 128
        x3 = x.reshape(B, (Tx * D) // 128, 128)
        y3 = y.reshape(B, (Ty * D) // 128, 128)
    else:
        # TODO(synk): non-128-aligned case runs at D/128 lane utilization; a
        # lane-dense main body + tiny jnp remainder epilogue would recover it.
        lanes = D
        x3, y3 = x, y

    rows_valid = -(-(T * D) // lanes)                        # cdiv
    rows_tile = min(_round_up(rows_per_tile, 8), _round_up(rows_valid, 8))
    n_tiles = -(-rows_valid // rows_tile)                    # cdiv
    n_half = -(-n_tiles // 2)                                # tiles per megacore half

    tile_elems = rows_tile * lanes
    last_tile = jnp.maximum(
        (valid_elems + tile_elems - 1) // tile_elems - 1, 0).astype(jnp.int32)

    partials = _masked_l1_partials(last_tile, valid_elems, x3, y3,
                                   rows_tile, n_half)
    total = jnp.sum(partials)
    denom = jnp.sum(valid_elems).astype(jnp.float32)
    # NB: like the PyTorch reference, no guard for an all-pad batch (denom==0).
    return total / denom


def _reference_loss(x, y, x_lens, y_lens):
    """Pure-JAX reference mirroring the PyTorch module."""
    Tx, Ty = x.shape[1], y.shape[1]
    if Tx > Ty:
        x = x[:, :Ty]
        lens = y_lens
    else:
        y = y[:, :Tx]
        lens = x_lens
    T = x.shape[1]
    mask = (jnp.arange(T)[None, :] < jnp.minimum(lens, T)[:, None])[..., None]
    mask = jnp.broadcast_to(mask, x.shape).astype(jnp.float32)
    return jnp.sum(jnp.abs(x - y) * mask) / jnp.sum(mask)


if __name__ == "__main__":
    key = jax.random.PRNGKey(0)
    k1, k2, k3, k4 = jax.random.split(key, 4)

    # Case 1: lane-dense path, x longer than y -> mask from y_lens.
    # Small rows_per_tile exercises: interior fast-path tiles, the straddling
    # boundary tile, an exact tile boundary (lens=16 -> 1024 elems), and
    # fully-padded tiles whose DMAs are skipped (lens=8).
    B, D = 3, 64
    Tx, Ty = 48, 40
    x = jax.random.normal(k1, (B, Tx, D), dtype=jnp.float32)
    y = jax.random.normal(k2, (B, Ty, D), dtype=jnp.float32)
    x_lens = jnp.array([48, 48, 48], dtype=jnp.int32)
    y_lens = jnp.array([40, 8, 16], dtype=jnp.int32)
    loss1 = masked_l1_loss(x, y, x_lens, y_lens, rows_per_tile=8)
    jax.block_until_ready(loss1)
    ref1 = _reference_loss(x, y, x_lens, y_lens)
    assert jnp.allclose(loss1, ref1, atol=1e-5, rtol=1e-4), (loss1, ref1)

    # Case 1b: same data, default (large) tile -> single-tile-per-half path.
    loss1b = masked_l1_loss(x, y, x_lens, y_lens)
    jax.block_until_ready(loss1b)
    assert jnp.allclose(loss1b, ref1, atol=1e-5, rtol=1e-4), (loss1b, ref1)

    # Case 1c: bf16 inputs (elementwise math stays bf16, accumulation in f32).
    xb, yb = x.astype(jnp.bfloat16), y.astype(jnp.bfloat16)
    loss1c = masked_l1_loss(xb, yb, x_lens, y_lens, rows_per_tile=8)
    jax.block_until_ready(loss1c)
    ref1c = _reference_loss(xb, yb, x_lens, y_lens)
    assert jnp.allclose(loss1c, ref1c, atol=1e-2, rtol=3e-2), (loss1c, ref1c)

    # Case 2: fallback path (D=20 not lane-dense), y longer than x -> mask
    # from x_lens; includes a batch whose length equals the full T (exact
    # full-tile branch) and a partially padded batch.
    B, D = 2, 20
    Tx, Ty = 16, 24
    x = jax.random.normal(k3, (B, Tx, D), dtype=jnp.float32)
    y = jax.random.normal(k4, (B, Ty, D), dtype=jnp.float32)
    x_lens = jnp.array([16, 9], dtype=jnp.int32)
    y_lens = jnp.array([24, 20], dtype=jnp.int32)
    loss2 = masked_l1_loss(x, y, x_lens, y_lens)
    jax.block_until_ready(loss2)
    ref2 = _reference_loss(x, y, x_lens, y_lens)
    assert jnp.allclose(loss2, ref2, atol=1e-5, rtol=1e-4), (loss2, ref2)

    print("KERNEL_OK")
</pallas_src>

<mosaic_0001>
module attributes {stable_mosaic.version = 11 : i64} {
  func.func @_masked_abs_sum_kernel(%arg0: i32, %arg1: i32, %arg2: i32, %arg3: memref<3xi32, #tpu.memory_space<smem>>, %arg4: memref<3xi32, #tpu.memory_space<smem>>, %arg5: memref<1x8x128xf32, #tpu.memory_space<vmem>>, %arg6: memref<1x8x128xf32, #tpu.memory_space<vmem>>, %arg7: memref<1x1x8x128xf32, #tpu.memory_space<vmem>>) attributes {dimension_semantics = [#tpu.dimension_semantics<parallel>, #tpu.dimension_semantics<parallel>, #tpu.dimension_semantics<arbitrary>], iteration_bounds = array<i64: 3, 2, 2>, scalar_prefetch = 2 : i64, scratch_operands = 0 : i64, tpu.core_type = #tpu.core_type<tc>, window_params = [{transform_indices = @transform_0, window_bounds = array<i64: 1, 8, 128>}, {transform_indices = @transform_1, window_bounds = array<i64: 1, 8, 128>}, {transform_indices = @transform_2, window_bounds = array<i64: 1, 1, 8, 128>}]} {
    %c2_i32 = arith.constant 2 : i32
    %0 = arith.muli %arg1, %c2_i32 : i32
    %1 = arith.addi %0, %arg2 : i32
    %c0_i32 = arith.constant 0 : i32
    %2 = arith.cmpi eq, %arg2, %c0_i32 : i32
    %3 = arith.extui %2 : i1 to i32
    %c0_i32_0 = arith.constant 0 : i32
    %4 = arith.cmpi ne, %3, %c0_i32_0 : i32
    scf.if %4 {
      %cst = arith.constant 0.000000e+00 : f32
      %17 = vector.broadcast %cst : f32 to vector<8x128xf32>
      %c0 = arith.constant 0 : index
      %c0_4 = arith.constant 0 : index
      %c0_5 = arith.constant 0 : index
      %c0_6 = arith.constant 0 : index
      %18 = vector.load %arg7[%c0, %c0_4, %c0_5, %c0_6] : memref<1x1x8x128xf32, #tpu.memory_space<vmem>>, vector<1x1x8x128xf32>
      %19 = vector.shape_cast %18 : vector<1x1x8x128xf32> to vector<8x128xf32>
      %20 = vector.shape_cast %17 : vector<8x128xf32> to vector<1x1x8x128xf32>
      tpu.vector_store %arg7[%c0, %c0_4, %c0_5, %c0_6], %20 {strides = array<i32>} : memref<1x1x8x128xf32, #tpu.memory_space<vmem>>, vector<1x1x8x128xf32>,
    } else {
    }
    %5 = arith.index_cast %arg0 : i32 to index
    %6 = memref.load %arg4[%5] : memref<3xi32, #tpu.memory_space<smem>>
    %c1024_i32 = arith.constant 1024 : i32
    %7 = arith.muli %1, %c1024_i32 : i32
    %c1024_i32_1 = arith.constant 1024 : i32
    %8 = arith.addi %7, %c1024_i32_1 : i32
    %9 = arith.cmpi sle, %8, %6 : i32
    %10 = arith.extui %9 : i1 to i32
    %c0_i32_2 = arith.constant 0 : i32
    %11 = arith.cmpi ne, %10, %c0_i32_2 : i32
    scf.if %11 {
      %c0 = arith.constant 0 : index
      %c0_4 = arith.constant 0 : index
      %c0_5 = arith.constant 0 : index
      %17 = vector.load %arg5[%c0, %c0_4, %c0_5] : memref<1x8x128xf32, #tpu.memory_space<vmem>>, vector<1x8x128xf32>
      %18 = vector.shape_cast %17 : vector<1x8x128xf32> to vector<8x128xf32>
      %c0_6 = arith.constant 0 : index
      %c0_7 = arith.constant 0 : index
      %c0_8 = arith.constant 0 : index
      %19 = vector.load %arg6[%c0_6, %c0_7, %c0_8] : memref<1x8x128xf32, #tpu.memory_space<vmem>>, vector<1x8x128xf32>
      %20 = vector.shape_cast %19 : vector<1x8x128xf32> to vector<8x128xf32>
      %21 = arith.subf %18, %20 : vector<8x128xf32>
      %22 = math.absf %21 : vector<8x128xf32>
      %c0_9 = arith.constant 0 : index
      %c0_10 = arith.constant 0 : index
      %c0_11 = arith.constant 0 : index
      %c0_12 = arith.constant 0 : index
      %23 = vector.load %arg7[%c0_9, %c0_10, %c0_11, %c0_12] : memref<1x1x8x128xf32, #tpu.memory_space<vmem>>, vector<1x1x8x128xf32>
      %24 = vector.shape_cast %23 : vector<1x1x8x128xf32> to vector<8x128xf32>
      %25 = vector.shape_cast %22 : vector<8x128xf32> to vector<1x8x128xf32>
      %cst = arith.constant dense<0.000000e+00> : vector<8x128xf32>
      %26 = vector.multi_reduction <add>, %25, %cst [0] : vector<1x8x128xf32> to vector<8x128xf32>
      %27 = arith.addf %24, %26 : vector<8x128xf32>
      %c0_13 = arith.constant 0 : index
      %c0_14 = arith.constant 0 : index
      %c0_15 = arith.constant 0 : index
      %c0_16 = arith.constant 0 : index
      %28 = vector.load %arg7[%c0_13, %c0_14, %c0_15, %c0_16] : memref<1x1x8x128xf32, #tpu.memory_space<vmem>>, vector<1x1x8x128xf32>
      %29 = vector.shape_cast %28 : vector<1x1x8x128xf32> to vector<8x128xf32>
      %30 = vector.shape_cast %27 : vector<8x128xf32> to vector<1x1x8x128xf32>
      tpu.vector_store %arg7[%c0_13, %c0_14, %c0_15, %c0_16], %30 {strides = array<i32>} : memref<1x1x8x128xf32, #tpu.memory_space<vmem>>, vector<1x1x8x128xf32>,
    } else {
    }
    %12 = arith.cmpi slt, %7, %6 : i32
    %13 = arith.cmpi slt, %6, %8 : i32
    %14 = arith.andi %12, %13 : i1
    %15 = arith.extui %14 : i1 to i32
    %c0_i32_3 = arith.constant 0 : i32
    %16 = arith.cmpi ne, %15, %c0_i32_3 : i32
    scf.if %16 {
      %17 = tpu.iota {dimensions = array<i32: 0>} : vector<8x128xi32>
      %18 = tpu.iota {dimensions = array<i32: 1>} : vector<8x128xi32>
      %c128_i32 = arith.constant 128 : i32
      %19 = vector.broadcast %c128_i32 : i32 to vector<8x128xi32>
      %20 = arith.muli %17, %19 : vector<8x128xi32>
      %21 = vector.broadcast %7 : i32 to vector<8x128xi32>
      %22 = arith.addi %21, %20 : vector<8x128xi32>
      %23 = arith.addi %22, %18 : vector<8x128xi32>
      %c0 = arith.constant 0 : index
      %c0_4 = arith.constant 0 : index
      %c0_5 = arith.constant 0 : index
      %24 = vector.load %arg5[%c0, %c0_4, %c0_5] : memref<1x8x128xf32, #tpu.memory_space<vmem>>, vector<1x8x128xf32>
      %25 = vector.shape_cast %24 : vector<1x8x128xf32> to vector<8x128xf32>
      %c0_6 = arith.constant 0 : index
      %c0_7 = arith.constant 0 : index
      %c0_8 = arith.constant 0 : index
      %26 = vector.load %arg6[%c0_6, %c0_7, %c0_8] : memref<1x8x128xf32, #tpu.memory_space<vmem>>, vector<1x8x128xf32>
      %27 = vector.shape_cast %26 : vector<1x8x128xf32> to vector<8x128xf32>
      %28 = arith.subf %25, %27 : vector<8x128xf32>
      %29 = math.absf %28 : vector<8x128xf32>
      %30 = vector.broadcast %6 : i32 to vector<8x128xi32>
      %31 = arith.cmpi slt, %23, %30 : vector<8x128xi32>
      %cst = arith.constant 0.000000e+00 : f32
      %32 = vector.broadcast %cst : f32 to vector<8x128xf32>
      %33 = arith.select %31, %29, %32 : vector<8x128xi1>, vector<8x128xf32>
      %c0_9 = arith.constant 0 : index
      %c0_10 = arith.constant 0 : index
      %c0_11 = arith.constant 0 : index
      %c0_12 = arith.constant 0 : index
      %34 = vector.load %arg7[%c0_9, %c0_10, %c0_11, %c0_12] : memref<1x1x8x128xf32, #tpu.memory_space<vmem>>, vector<1x1x8x128xf32>
      %35 = vector.shape_cast %34 : vector<1x1x8x128xf32> to vector<8x128xf32>
      %36 = vector.shape_cast %33 : vector<8x128xf32> to vector<1x8x128xf32>
      %cst_13 = arith.constant dense<0.000000e+00> : vector<8x128xf32>
      %37 = vector.multi_reduction <add>, %36, %cst_13 [0] : vector<1x8x128xf32> to vector<8x128xf32>
      %38 = arith.addf %35, %37 : vector<8x128xf32>
      %c0_14 = arith.constant 0 : index
      %c0_15 = arith.constant 0 : index
      %c0_16 = arith.constant 0 : index
      %c0_17 = arith.constant 0 : index
      %39 = vector.load %arg7[%c0_14, %c0_15, %c0_16, %c0_17] : memref<1x1x8x128xf32, #tpu.memory_space<vmem>>, vector<1x1x8x128xf32>
      %40 = vector.shape_cast %39 : vector<1x1x8x128xf32> to vector<8x128xf32>
      %41 = vector.shape_cast %38 : vector<8x128xf32> to vector<1x1x8x128xf32>
      tpu.vector_store %arg7[%c0_14, %c0_15, %c0_16, %c0_17], %41 {strides = array<i32>} : memref<1x1x8x128xf32, #tpu.memory_space<vmem>>, vector<1x1x8x128xf32>,
    } else {
    }
    return
  }
  func.func @transform_0(%arg0: i32, %arg1: i32, %arg2: i32, %arg3: memref<3xi32, #tpu.memory_space<smem>>, %arg4: memref<3xi32, #tpu.memory_space<smem>>) -> (i32, i32, i32) {
    %c2_i32 = arith.constant 2 : i32
    %0 = arith.muli %arg1, %c2_i32 : i32
    %1 = arith.addi %0, %arg2 : i32
    %2 = arith.index_cast %arg0 : i32 to index
    %3 = memref.load %arg3[%2] : memref<3xi32, #tpu.memory_space<smem>>
    %4 = arith.minsi %1, %3 : i32
    %c0_i32 = arith.constant 0 : i32
    %c0_i32_0 = arith.constant 0 : i32
    return %arg0, %4, %c0_i32 : i32, i32, i32
  }
  func.func @transform_1(%arg0: i32, %arg1: i32, %arg2: i32, %arg3: memref<3xi32, #tpu.memory_space<smem>>, %arg4: memref<3xi32, #tpu.memory_space<smem>>) -> (i32, i32, i32) {
    %c2_i32 = arith.constant 2 : i32
    %0 = arith.muli %arg1, %c2_i32 : i32
    %1 = arith.addi %0, %arg2 : i32
    %2 = arith.index_cast %arg0 : i32 to index
    %3 = memref.load %arg3[%2] : memref<3xi32, #tpu.memory_space<smem>>
    %4 = arith.minsi %1, %3 : i32
    %c0_i32 = arith.constant 0 : i32
    %c0_i32_0 = arith.constant 0 : i32
    return %arg0, %4, %c0_i32 : i32, i32, i32
  }
  func.func @transform_2(%arg0: i32, %arg1: i32, %arg2: i32, %arg3: memref<3xi32, #tpu.memory_space<smem>>, %arg4: memref<3xi32, #tpu.memory_space<smem>>) -> (i32, i32, i32, i32) {
    %c0_i32 = arith.constant 0 : i32
    %c0_i32_0 = arith.constant 0 : i32
    %c0_i32_1 = arith.constant 0 : i32
    return %arg0, %arg1, %c0_i32, %c0_i32_0 : i32, i32, i32, i32
  }
}

</mosaic_0001>

<bundles_post_ra>
// kernel: masked_l1_loss.1
= control target key start
LH: loop header
LB: loop body
LE: loop exit
PB: predicated region body
PF: predicated region fallthrough
CT: control target
= control target key end

     0   :  { %s618_s21 = smov [#allocation3]   ;;  %s619_s22 = smov [#allocation4]   ;;  %s755_s0 = inlined_call_operand.vmem [shape: s32[3], index: 0, kind: input, shape index: {}]   ;;  %s756_s2 = inlined_call_operand.vmem [shape: f32[3,24,128], index: 2, kind: input, shape index: {}]   ;;  %s757_s3 = inlined_call_operand.vmem [shape: f32[3,20,128], index: 3, kind: input, shape index: {}]   ;;  %s758_s4 = inlined_call_operand.vmem [shape: f32[3,2,8,128], index: 4, kind: output, shape index: {}]   ;;  %s759_s1 = inlined_call_operand.vmem [shape: s32[3], index: 1, kind: input, shape index: {}]  }
   0x1   :  { %s10_s17 = sshll.u32 %s755_s0, 4  ;;  %s15_s20 = sshll.u32 %s759_s1, 4  ;;  %s11_s17 = int_to_ptr.vmem [resolvable:$true] %s10_s17  ;;  %s16_s20 = int_to_ptr.vmem [resolvable:$true] %s15_s20 }
   0x2   :  { %13 = dma.vmem_to_smem %s11_s17, 16, %s618_s21, [#allocation2] }
   0x3   :  { %18 = dma.vmem_to_smem %s16_s20, 16, %s619_s22, [#allocation2] }
   0x4   :  { %588 = dma.done.wait [#allocation2], 32 }
   0x5   :  { %589 = vsyncadd [#allocation2], 4294967264 }
   0x6   :  { %21 = sfence }
   0x7   :  { %s652_s23 = smov 0   ;;  %s654_s24 = smov 0  }
   0x8   :  { %s656_s25 = smov 0   ;;  %s658_s0 = smov 0  }
   0x9   :  { %s660_s26 = smov 0   ;;  %s662_s1 = smov 0  }
   0xa   :  { %s664_s27 = smov 0  }
   0xb LB: > { %s39_s28 = sadd.s32 1, %s604_s0  ;;  %s42_s29 = sadd.s32 1, %s608_s26  ;;  %s616_s27 = sphi %s664_s27, %s27_s27   ;;  %s612_s1 = sphi %s662_s1, %s765_s1   ;;  %s608_s26 = sphi %s660_s26, %s764_s26   ;;  %s604_s0 = sphi %s658_s0, %s763_s0   ;;  %s600_s25 = sphi %s656_s25, %s762_s25   ;;  %s596_s24 = sphi %s654_s24, %s761_s24   ;;  %s592_s23 = sphi %s652_s23, %s760_s23  }
   0xc   : > { %p40_p0 = scmp.ge.s32.totalorder %s39_s28, 2  ;;  %p463_p1 = scmp.ge.s32.totalorder %s616_s27, 1 }
   0xd   : > { %p208_p2 = scmp.lt.s32.totalorder %s616_s27, 13  ;;  %s46_s30 = sadd.s32 1, %s612_s1 }
   0xe   : > { %s767_s28 = smov (%p40_p0, %s39_s28), 0  ;;  %s769_s29 = smov (!%p40_p0, %s42_s29), %s608_s26 }
   0xf   : > { %p209_p3 = pnand %p463_p1, %p208_p2  ;;  %p44_p4 = scmp.ge.s32.totalorder %s769_s29, 2 }
  0x10   : > { %s464_s5 = sshll.u32 (!%p209_p3), %s596_s24, 1  ;;  %s256_s6 = sld [smem:[#allocation3 + %s600_s25]] (!%p209_p3) }
  0x11   : > { %s771_s29 = smov (%p44_p4, %s769_s29), 0  ;;  %s773_s30 = smov (!%p44_p4, %s46_s30), %s612_s1 }
  0x12   : > { %p48_p5 = scmp.ge.s32.totalorder %s773_s30, 3  ;;  %212 = sbr.rel (%p209_p3) target bundleno = 87 (0x57), region = 28 }
  0x13   : > { %s700_s7 = sadd.s32 (!%p209_p3), %s592_s23, %s464_s5  ;;  %p259_p6 = scmp.lt.s32.totalorder (!%p209_p3), %s600_s25, 2 }
  0x14   : > { %s775_s30 = smov (%p48_p5, %s773_s30), 0  ;;  %s274_s8 = sld [smem:[#allocation3 + %s600_s25]] (!%p209_p3) }
  0x15   : > { %p292_p7 = scmp.lt.s32.totalorder (!%p209_p3), %s596_s24, 1  ;;  %p471_p12 = scmp.ne.s32.totalorder (!%p209_p3), %s592_s23, 0 }
  0x16   : > { %p257_p8 = scmp.lt.s32.totalorder (!%p209_p3), %s700_s7, %s256_s6 }
  0x17   : > { %s260_s9 = scalar_select %p259_p6, %s600_s25, 2 }
  0x18   : > { %s777_s24 = smov (!%p292_p7, %s596_s24), 1 }
  0x19   : > { %s468_s10 = sshll.u32 %s260_s9, 1  ;;  %s476_s17 = smul.u32 3, %s260_s9 }
  0x1a   : > { %s295_s11 = sadd.s32 %s468_s10, %s777_s24  ;;  %p275_p9 = scmp.lt.s32.totalorder %s700_s7, %s274_s8 }
  0x1b   : > { %s469_s12 = sshll.u32 %s295_s11, 3 }
  0x1c   : > { %s258_s13 = scalar_select %p257_p8, %s700_s7, %s256_s6 }
  0x1d   : > { %s711_s16 = scalar_lea.vmem %s758_s4, %s469_s12 }
  0x1e   : > { %p261_p10 = scmp.lt.s32.totalorder %s258_s13, 2 }
  0x1f   : > { %s276_s18 = scalar_select %p275_p9, %s700_s7, %s274_s8 }
  0x20   : > { %s779_s13 = smov (!%p261_p10, %s258_s13), 2 }
  0x21   : > { %p279_p11 = scmp.lt.s32.totalorder %s276_s18, 2  ;;  %s264_s19 = sadd.s32 %s476_s17, %s779_s13 }
  0x22   : > { %s465_s20 = sshll.u32 %s264_s19, 3  ;;  %303 = sbr.rel (%p471_p12) target bundleno = 41 (0x29), region = 32 }
  0x23   : > { %s266_s5 = scalar_lea.vmem %s756_s2, %s465_s20  ;;  %s781_s18 = smov (!%p279_p11, %s276_s18), 2 }
  0x24   : > { %s282_s24 = sadd.s32 %s476_s17, %s781_s18 }
  0x25   : > { %s467_s6 = sshll.u32 %s282_s24, 3 }
  0x26   : > { %s284_s14 = scalar_lea.vmem %s757_s3, %s467_s6 }
  0x27   : > { %v620_v0 = vmov 0.0  }
  0x28   : > { %304 = vst [vmem:[%s711_s16] sm:$0xff] %v620_v0 }
  0x29 PF: > { %s723_s8 = sld [smem:[#allocation4 + %s600_s25]]  ;;  %s472_s9 = sshll.u32 %s700_s7, 10 }
  0x2a   : > { %s307_s12 = sadd.s32 1024, %s472_s9 }
  0x2f   : > { %p473_p13 = scmp.gt.s32.totalorder %s307_s12, %s723_s8 }
  0x31   : > { %311 = sbr.rel (%p473_p13) target bundleno = 63 (0x3f), region = 36 }
  0x36   : > { %v312_v1 = vld [vmem:[%s266_s5] sm:$0xff] }
  0x37   : > { %v313_v2 = vld [vmem:[%s284_s14] sm:$0xff] }
  0x38   : > { %v314_v3 = vsub.f32 %v312_v1, %v313_v2  ;;  %v316_v4 = vld [vmem:[%s711_s16] sm:$0xff] }
  0x3a   : > { %v315_v5 = vand.u32 2147483647, %v314_v3 }
  0x3c   : > { %v318_v6 = vadd.f32 %v316_v4, %v315_v5 }
  0x3e   : > { %319 = vst [vmem:[%s711_s16] sm:$0xff] %v318_v6 }
  0x3f PF: > { %p320_p0 = scmp.lt.s32.totalorder %s472_s9, %s723_s8  ;;  %p321_p1 = scmp.lt.s32.totalorder %s723_s8, %s307_s12 }
  0x41   : > { %p322_p2 = pnand %p321_p1, %p320_p0 }
  0x43   : > { %325 = sbr.rel (%p322_p2) target bundleno = 87 (0x57), region = 40 }
  0x48   : > { %v326_v7 = vlaneseq  ;;  %v334_v8 = vld [vmem:[%s266_s5] sm:$0xff]  ;;  %v331_v11 = vstv %s472_s9  ;;  %v338_v17 = vstv %s723_s8 }
  0x49   : > { %v335_v9 = vld [vmem:[%s284_s14] sm:$0xff] }
  0x4a   : > { %v327_v10 = vshrl.u32 %v326_v7, 7  ;;  %v336_v12 = vsub.f32 %v334_v8, %v335_v9  ;;  %v329_v13 = vand.u32 127, %v326_v7  ;;  %v341_v19 = vld [vmem:[%s711_s16] sm:$0xff] }
  0x4c   : > { %v330_v14 = vmul.u32 128, %v327_v10  ;;  %v337_v16 = vand.u32 2147483647, %v336_v12 }
  0x4e   : > { %v332_v15 = vadd.s32 %v331_v11, %v330_v14 }
  0x50   : > { %v333_v18 = vadd.s32 %v332_v15, %v329_v13 }
  0x52   : > { %vm339_vm0 = vcmp.lt.s32.totalorder %v333_v18, %v338_v17 }
  0x53   : > { %v340_v20 = vsel %vm339_vm0, %v337_v16, 0.0 }
  0x54   : > { %v343_v21 = vadd.f32 %v341_v19, %v340_v20 }
  0x56   : > { %344 = vst [vmem:[%s711_s16] sm:$0xff] %v343_v21 }
  0x57 PF: > { %s27_s27 = sadd.s32 1, %s616_s27   ;;  %s760_s23 = smov %s604_s0 }
  0x58   : > { %p24_p3 = scmp.ge.s32.totalorder %s27_s27, 14   ;;  %s761_s24 = smov %s608_s26 }
  0x59   : > { %s762_s25 = smov %s612_s1  ;;  %s763_s0 = smov %s767_s28 }
  0x5a   : > { %s764_s26 = smov %s771_s29  ;;  %s765_s1 = smov %s775_s30 }
  0x5b   :  { %26 = sbr.rel (!%p24_p3) target bundleno = 11 (0xb), region = 73 }

</bundles_post_ra>
